<compile_context>
chip_gen: v6e
topology: v6e:2x2x1
jax: 0.10.0
libtpu: 0.0.40
codegen_flags: <defaults>
</compile_context>

<pallas_src>
import functools

import jax
import jax.numpy as jnp
from jax.experimental import pallas as pl
from jax.experimental.pallas import tpu as pltpu

# ---------------- config (synthetic, small) ----------------
B = 2        # batch
S = 8        # sequence length
D = 32       # d_emb
H = 4        # number of attention heads
DH = D // H  # head dim
LN_EPS = 1e-5
NEG_INF = -1e9


def _layer_norm(x, gamma, beta, eps=LN_EPS):
    mu = jnp.mean(x, axis=-1, keepdims=True)
    var = jnp.mean((x - mu) ** 2, axis=-1, keepdims=True)
    return (x - mu) * jax.lax.rsqrt(var + eps) * gamma + beta


def _encoder_layer_kernel(
    x_ref, qid_ref, kid_ref,
    wqkv_ref, bqkv_ref, wo_ref, bo_ref,
    g1_ref, b1_ref,
    wf_ref, bf_ref,
    g2_ref, b2_ref,
    out_ref,
    *, n_head, d_emb,
):
    dh = d_emb // n_head

    x = x_ref[...]  # (N, D) f32, N = B*S (batch packed along rows)

    # ---- fused QKV projection (1/sqrt(dh) pre-folded into the Q columns) ----
    qkv = jnp.dot(x, wqkv_ref[...], preferred_element_type=jnp.float32) + bqkv_ref[...]
    q = qkv[:, :d_emb]
    k = qkv[:, d_emb:2 * d_emb]
    v = qkv[:, 2 * d_emb:]

    # ---- additive attention bias for the packed batch, from O(N) inputs ----
    # qid: (N, 1) batch id per query row; kid: (1, N) batch id per key, or -1
    # for padded keys.  attend <=> same batch element AND key not padded.
    attend = qid_ref[...] == kid_ref[...]      # (N, N) bool
    bias = jnp.where(attend, 0.0, NEG_INF)     # (N, N) f32, reused by all heads

    # ---- multi-head self-attention (heads statically unrolled, all 2D) ----
    ctx_parts = []
    for h in range(n_head):
        lo, hi = h * dh, (h + 1) * dh
        qh, kh, vh = q[:, lo:hi], k[:, lo:hi], v[:, lo:hi]
        # q @ k^T by contracting the last dims directly (no explicit kh.T).
        s = jax.lax.dot_general(qh, kh, (((1,), (1,)), ((), ())),
                                preferred_element_type=jnp.float32)
        s = s + bias
        s = s - jnp.max(s, axis=-1, keepdims=True)
        p = jnp.exp(s)
        # EUP reciprocal instead of a VALU divide.
        p = p * pl.reciprocal(jnp.sum(p, axis=-1, keepdims=True), approx=True)
        ctx_parts.append(jnp.dot(p, vh, preferred_element_type=jnp.float32))
    ctx = jnp.concatenate(ctx_parts, axis=-1)  # (N, D)

    attn_out = jnp.dot(ctx, wo_ref[...], preferred_element_type=jnp.float32) + bo_ref[...]

    # ---- residual + norm1 ----
    h1 = _layer_norm(x + attn_out, g1_ref[...], b1_ref[...])

    # ---- feedforward (single Linear, as in the module) + residual + norm2 ----
    ff = jnp.dot(h1, wf_ref[...], preferred_element_type=jnp.float32) + bf_ref[...]
    h2 = _layer_norm(h1 + ff, g2_ref[...], b2_ref[...])

    out_ref[...] = h2.astype(out_ref.dtype)


def encoder_layer(x, key_valid, params):
    """x: (B, S, D) f32; key_valid: (B, S) f32 (1.0 = real key, 0.0 = padded key)."""
    b, s, d = x.shape
    n = b * s
    scale = 1.0 / ((d // H) ** 0.5)

    # Pack the batch into one (N, D) slab: single grid step, one DMA per operand.
    x2d = x.reshape(n, d)

    # O(N) mask inputs instead of a dense (B, S, S) mask.
    batch_id = jnp.repeat(jnp.arange(b, dtype=jnp.float32), s)            # (N,)
    q_bid = batch_id.reshape(n, 1)
    k_bid = jnp.where(key_valid.reshape(n) > 0.0, batch_id, -1.0).reshape(1, n)

    # Fuse Q/K/V into one (D, 3D) matmul; fold the 1/sqrt(dh) score scale into
    # the Q weights/bias (exactly equivalent, free at runtime).
    wqkv = jnp.concatenate(
        [params["wq_t"] * scale, params["wk_t"], params["wv_t"]], axis=1)
    bqkv = jnp.concatenate(
        [params["bq"] * scale, params["bk"], params["bv"]], axis=1)

    weight_args = (
        wqkv, bqkv, params["wo_t"], params["bo"],
        params["g1"], params["b1"],
        params["wf_t"], params["bf"],
        params["g2"], params["b2"],
    )

    def full_spec(arr):
        shp = arr.shape
        return pl.BlockSpec(shp, lambda i, _n=len(shp): (0,) * _n)

    kernel = functools.partial(_encoder_layer_kernel, n_head=H, d_emb=d)

    out2d = pl.pallas_call(
        kernel,
        out_shape=jax.ShapeDtypeStruct((n, d), jnp.float32),
        grid_spec=pltpu.PrefetchScalarGridSpec(
            num_scalar_prefetch=0,
            # Whole problem is a few KB -> one grid step (no per-step overhead).
            # NOTE(v7x): use grid=(2,) over batch + ("parallel",) to feed both
            # TensorCores on v7x; on v5e/v6e (1 TC) that is pure overhead.
            grid=(1,),
            in_specs=[full_spec(x2d), full_spec(q_bid), full_spec(k_bid)]
                     + [full_spec(w) for w in weight_args],
            out_specs=pl.BlockSpec((n, d), lambda i: (0, 0)),
        ),
        compiler_params=pltpu.CompilerParams(
            dimension_semantics=("arbitrary",)),
    )(x2d, q_bid, k_bid, *weight_args)

    return out2d.reshape(b, s, d)


# ---------------- pure-JAX reference (for correctness check) ----------------
def encoder_layer_ref(x, mask, params):
    q = x @ params["wq_t"] + params["bq"]
    k = x @ params["wk_t"] + params["bk"]
    v = x @ params["wv_t"] + params["bv"]
    bsz, s, d = x.shape
    q = q.reshape(bsz, s, H, DH).transpose(0, 2, 1, 3)
    k = k.reshape(bsz, s, H, DH).transpose(0, 2, 1, 3)
    v = v.reshape(bsz, s, H, DH).transpose(0, 2, 1, 3)
    scores = jnp.einsum("bhqd,bhkd->bhqk", q, k) / (DH ** 0.5)
    scores = jnp.where(mask[:, None] > 0.0, scores, -1e9)
    p = jax.nn.softmax(scores, axis=-1)
    ctx = jnp.einsum("bhqk,bhkd->bhqd", p, v).transpose(0, 2, 1, 3).reshape(bsz, s, d)
    attn_out = ctx @ params["wo_t"] + params["bo"]

    def ln(z, g, bta):
        mu = jnp.mean(z, axis=-1, keepdims=True)
        var = jnp.mean((z - mu) ** 2, axis=-1, keepdims=True)
        return (z - mu) * jax.lax.rsqrt(var + LN_EPS) * g + bta

    h1 = ln(x + attn_out, params["g1"], params["b1"])
    ff = h1 @ params["wf_t"] + params["bf"]
    return ln(h1 + ff, params["g2"], params["b2"])


def init_params(key):
    keys = jax.random.split(key, 6)
    std = 0.02

    def lin(k):
        # PyTorch Linear weight is (out, in); we store transposed (in, out).
        w = jax.random.normal(k, (D, D), jnp.float32) * std
        b = jnp.zeros((1, D), jnp.float32)
        return w, b

    wq_t, bq = lin(keys[0])
    wk_t, bk = lin(keys[1])
    wv_t, bv = lin(keys[2])
    wo_t, bo = lin(keys[3])
    wf_t, bf = lin(keys[4])
    return dict(
        wq_t=wq_t, bq=bq, wk_t=wk_t, bk=bk, wv_t=wv_t, bv=bv,
        wo_t=wo_t, bo=bo, wf_t=wf_t, bf=bf,
        g1=jnp.ones((1, D), jnp.float32), b1=jnp.zeros((1, D), jnp.float32),
        g2=jnp.ones((1, D), jnp.float32), b2=jnp.zeros((1, D), jnp.float32),
    )


if __name__ == "__main__":
    key = jax.random.PRNGKey(0)
    kx, kp = jax.random.split(key)
    x = jax.random.normal(kx, (B, S, D), jnp.float32)

    # Deterministic padding-style mask: batch 0 attends to all keys,
    # batch 1 masks out the last two key positions.
    key_valid = jnp.ones((B, S), jnp.float32).at[1, -2:].set(0.0)
    # Dense (B, S, S) mask only for the pure-JAX reference (kernel gets key_valid).
    mask_full = jnp.broadcast_to(key_valid[:, None, :], (B, S, S)).astype(jnp.float32)

    params = init_params(kp)

    out = encoder_layer(x, key_valid, params)
    out = jax.block_until_ready(out)

    ref = encoder_layer_ref(x, mask_full, params)
    assert out.shape == (B, S, D)
    # Tolerance loosened slightly vs f64-exactness because softmax uses the
    # EUP approximate reciprocal (error contribution here is ~1e-5).
    assert jnp.allclose(out, ref, atol=1e-3, rtol=1e-3), "mismatch vs reference"

    print("KERNEL_OK")
</pallas_src>

<mosaic_0001>
module attributes {stable_mosaic.version = 11 : i64} {
  func.func @_encoder_layer_kernel(%arg0: i32, %arg1: memref<16x32xf32, #tpu.memory_space<vmem>>, %arg2: memref<16x1xf32, #tpu.memory_space<vmem>>, %arg3: memref<1x16xf32, #tpu.memory_space<vmem>>, %arg4: memref<32x96xf32, #tpu.memory_space<vmem>>, %arg5: memref<1x96xf32, #tpu.memory_space<vmem>>, %arg6: memref<32x32xf32, #tpu.memory_space<vmem>>, %arg7: memref<1x32xf32, #tpu.memory_space<vmem>>, %arg8: memref<1x32xf32, #tpu.memory_space<vmem>>, %arg9: memref<1x32xf32, #tpu.memory_space<vmem>>, %arg10: memref<32x32xf32, #tpu.memory_space<vmem>>, %arg11: memref<1x32xf32, #tpu.memory_space<vmem>>, %arg12: memref<1x32xf32, #tpu.memory_space<vmem>>, %arg13: memref<1x32xf32, #tpu.memory_space<vmem>>, %arg14: memref<16x32xf32, #tpu.memory_space<vmem>>) attributes {dimension_semantics = [#tpu.dimension_semantics<arbitrary>], iteration_bounds = array<i64: 1>, scalar_prefetch = 0 : i64, scratch_operands = 0 : i64, tpu.core_type = #tpu.core_type<tc>, window_params = [{pipeline_mode = #tpu.pipeline_mode<synchronous>, transform_indices = @transform_0, window_bounds = array<i64: 16, 32>}, {pipeline_mode = #tpu.pipeline_mode<synchronous>, transform_indices = @transform_1, window_bounds = array<i64: 16, 1>}, {pipeline_mode = #tpu.pipeline_mode<synchronous>, transform_indices = @transform_2, window_bounds = array<i64: 1, 16>}, {pipeline_mode = #tpu.pipeline_mode<synchronous>, transform_indices = @transform_3, window_bounds = array<i64: 32, 96>}, {pipeline_mode = #tpu.pipeline_mode<synchronous>, transform_indices = @transform_4, window_bounds = array<i64: 1, 96>}, {pipeline_mode = #tpu.pipeline_mode<synchronous>, transform_indices = @transform_5, window_bounds = array<i64: 32, 32>}, {pipeline_mode = #tpu.pipeline_mode<synchronous>, transform_indices = @transform_6, window_bounds = array<i64: 1, 32>}, {pipeline_mode = #tpu.pipeline_mode<synchronous>, transform_indices = @transform_7, window_bounds = array<i64: 1, 32>}, {pipeline_mode = #tpu.pipeline_mode<synchronous>, transform_indices = @transform_8, window_bounds = array<i64: 1, 32>}, {pipeline_mode = #tpu.pipeline_mode<synchronous>, transform_indices = @transform_9, window_bounds = array<i64: 32, 32>}, {pipeline_mode = #tpu.pipeline_mode<synchronous>, transform_indices = @transform_10, window_bounds = array<i64: 1, 32>}, {pipeline_mode = #tpu.pipeline_mode<synchronous>, transform_indices = @transform_11, window_bounds = array<i64: 1, 32>}, {pipeline_mode = #tpu.pipeline_mode<synchronous>, transform_indices = @transform_12, window_bounds = array<i64: 1, 32>}, {pipeline_mode = #tpu.pipeline_mode<synchronous>, transform_indices = @transform_13, window_bounds = array<i64: 16, 32>}]} {
    %c0 = arith.constant 0 : index
    %c0_0 = arith.constant 0 : index
    %0 = vector.load %arg1[%c0, %c0_0] : memref<16x32xf32, #tpu.memory_space<vmem>>, vector<16x32xf32>
    %c0_1 = arith.constant 0 : index
    %c0_2 = arith.constant 0 : index
    %1 = vector.load %arg4[%c0_1, %c0_2] : memref<32x96xf32, #tpu.memory_space<vmem>>, vector<32x96xf32>
    %cst = arith.constant dense<0.000000e+00> : vector<16x96xf32>
    %2 = tpu.matmul %0, %1, %cst {dimension_numbers = #tpu.dot_dimension_numbers<[1], [0], [0], [1], [0, 0, 1, 1], [], []>} : vector<16x32xf32>, vector<32x96xf32>, vector<16x96xf32> -> vector<16x96xf32>
    %c0_3 = arith.constant 0 : index
    %c0_4 = arith.constant 0 : index
    %3 = vector.load %arg5[%c0_3, %c0_4] : memref<1x96xf32, #tpu.memory_space<vmem>>, vector<1x96xf32>
    %4 = vector.broadcast %3 : vector<1x96xf32> to vector<16x96xf32>
    %5 = arith.addf %2, %4 : vector<16x96xf32>
    %6 = vector.extract_strided_slice %5 {offsets = [0, 0], sizes = [16, 32], strides = [1, 1]} : vector<16x96xf32> to vector<16x32xf32>
    %7 = vector.extract_strided_slice %5 {offsets = [0, 32], sizes = [16, 32], strides = [1, 1]} : vector<16x96xf32> to vector<16x32xf32>
    %8 = vector.extract_strided_slice %5 {offsets = [0, 64], sizes = [16, 32], strides = [1, 1]} : vector<16x96xf32> to vector<16x32xf32>
    %c0_5 = arith.constant 0 : index
    %c0_6 = arith.constant 0 : index
    %9 = vector.load %arg2[%c0_5, %c0_6] : memref<16x1xf32, #tpu.memory_space<vmem>>, vector<16x1xf32>
    %c0_7 = arith.constant 0 : index
    %c0_8 = arith.constant 0 : index
    %10 = vector.load %arg3[%c0_7, %c0_8] : memref<1x16xf32, #tpu.memory_space<vmem>>, vector<1x16xf32>
    %11 = vector.broadcast %9 : vector<16x1xf32> to vector<16x16xf32>
    %12 = vector.broadcast %10 : vector<1x16xf32> to vector<16x16xf32>
    %13 = arith.cmpf oeq, %11, %12 : vector<16x16xf32>
    %cst_9 = arith.constant 0.000000e+00 : f32
    %cst_10 = arith.constant -1.000000e+09 : f32
    %14 = vector.broadcast %cst_9 : f32 to vector<16x16xf32>
    %15 = vector.broadcast %cst_10 : f32 to vector<16x16xf32>
    %16 = arith.select %13, %14, %15 : vector<16x16xi1>, vector<16x16xf32>
    %17 = vector.extract_strided_slice %6 {offsets = [0, 0], sizes = [16, 8], strides = [1, 1]} : vector<16x32xf32> to vector<16x8xf32>
    %18 = vector.extract_strided_slice %7 {offsets = [0, 0], sizes = [16, 8], strides = [1, 1]} : vector<16x32xf32> to vector<16x8xf32>
    %19 = vector.extract_strided_slice %8 {offsets = [0, 0], sizes = [16, 8], strides = [1, 1]} : vector<16x32xf32> to vector<16x8xf32>
    %cst_11 = arith.constant dense<0.000000e+00> : vector<16x16xf32>
    %20 = tpu.matmul %17, %18, %cst_11 {dimension_numbers = #tpu.dot_dimension_numbers<[1], [1], [0], [0], [0, 0, 1, 0], [], []>} : vector<16x8xf32>, vector<16x8xf32>, vector<16x16xf32> -> vector<16x16xf32>
    %21 = arith.addf %20, %16 : vector<16x16xf32>
    %cst_12 = arith.constant dense<0xFF800000> : vector<16xf32>
    %22 = vector.multi_reduction <maximumf>, %21, %cst_12 [1] : vector<16x16xf32> to vector<16xf32>
    %23 = vector.shape_cast %22 : vector<16xf32> to vector<16x1xf32>
    %24 = vector.broadcast %23 : vector<16x1xf32> to vector<16x16xf32>
    %25 = arith.subf %21, %24 : vector<16x16xf32>
    %26 = math.exp %25 : vector<16x16xf32>
    %cst_13 = arith.constant dense<0.000000e+00> : vector<16xf32>
    %27 = vector.multi_reduction <add>, %26, %cst_13 [1] : vector<16x16xf32> to vector<16xf32>
    %28 = vector.shape_cast %27 : vector<16xf32> to vector<16x1xf32>
    %29 = tpu.reciprocal %28 {approx = true} : vector<16x1xf32> -> vector<16x1xf32>
    %30 = vector.broadcast %29 : vector<16x1xf32> to vector<16x16xf32>
    %31 = arith.mulf %26, %30 : vector<16x16xf32>
    %cst_14 = arith.constant dense<0.000000e+00> : vector<16x8xf32>
    %32 = tpu.matmul %31, %19, %cst_14 {dimension_numbers = #tpu.dot_dimension_numbers<[1], [0], [0], [1], [0, 0, 1, 1], [], []>} : vector<16x16xf32>, vector<16x8xf32>, vector<16x8xf32> -> vector<16x8xf32>
    %33 = vector.extract_strided_slice %6 {offsets = [0, 8], sizes = [16, 8], strides = [1, 1]} : vector<16x32xf32> to vector<16x8xf32>
    %34 = vector.extract_strided_slice %7 {offsets = [0, 8], sizes = [16, 8], strides = [1, 1]} : vector<16x32xf32> to vector<16x8xf32>
    %35 = vector.extract_strided_slice %8 {offsets = [0, 8], sizes = [16, 8], strides = [1, 1]} : vector<16x32xf32> to vector<16x8xf32>
    %cst_15 = arith.constant dense<0.000000e+00> : vector<16x16xf32>
    %36 = tpu.matmul %33, %34, %cst_15 {dimension_numbers = #tpu.dot_dimension_numbers<[1], [1], [0], [0], [0, 0, 1, 0], [], []>} : vector<16x8xf32>, vector<16x8xf32>, vector<16x16xf32> -> vector<16x16xf32>
    %37 = arith.addf %36, %16 : vector<16x16xf32>
    %cst_16 = arith.constant dense<0xFF800000> : vector<16xf32>
    %38 = vector.multi_reduction <maximumf>, %37, %cst_16 [1] : vector<16x16xf32> to vector<16xf32>
    %39 = vector.shape_cast %38 : vector<16xf32> to vector<16x1xf32>
    %40 = vector.broadcast %39 : vector<16x1xf32> to vector<16x16xf32>
    %41 = arith.subf %37, %40 : vector<16x16xf32>
    %42 = math.exp %41 : vector<16x16xf32>
    %cst_17 = arith.constant dense<0.000000e+00> : vector<16xf32>
    %43 = vector.multi_reduction <add>, %42, %cst_17 [1] : vector<16x16xf32> to vector<16xf32>
    %44 = vector.shape_cast %43 : vector<16xf32> to vector<16x1xf32>
    %45 = tpu.reciprocal %44 {approx = true} : vector<16x1xf32> -> vector<16x1xf32>
    %46 = vector.broadcast %45 : vector<16x1xf32> to vector<16x16xf32>
    %47 = arith.mulf %42, %46 : vector<16x16xf32>
    %cst_18 = arith.constant dense<0.000000e+00> : vector<16x8xf32>
    %48 = tpu.matmul %47, %35, %cst_18 {dimension_numbers = #tpu.dot_dimension_numbers<[1], [0], [0], [1], [0, 0, 1, 1], [], []>} : vector<16x16xf32>, vector<16x8xf32>, vector<16x8xf32> -> vector<16x8xf32>
    %49 = vector.extract_strided_slice %6 {offsets = [0, 16], sizes = [16, 8], strides = [1, 1]} : vector<16x32xf32> to vector<16x8xf32>
    %50 = vector.extract_strided_slice %7 {offsets = [0, 16], sizes = [16, 8], strides = [1, 1]} : vector<16x32xf32> to vector<16x8xf32>
    %51 = vector.extract_strided_slice %8 {offsets = [0, 16], sizes = [16, 8], strides = [1, 1]} : vector<16x32xf32> to vector<16x8xf32>
    %cst_19 = arith.constant dense<0.000000e+00> : vector<16x16xf32>
    %52 = tpu.matmul %49, %50, %cst_19 {dimension_numbers = #tpu.dot_dimension_numbers<[1], [1], [0], [0], [0, 0, 1, 0], [], []>} : vector<16x8xf32>, vector<16x8xf32>, vector<16x16xf32> -> vector<16x16xf32>
    %53 = arith.addf %52, %16 : vector<16x16xf32>
    %cst_20 = arith.constant dense<0xFF800000> : vector<16xf32>
    %54 = vector.multi_reduction <maximumf>, %53, %cst_20 [1] : vector<16x16xf32> to vector<16xf32>
    %55 = vector.shape_cast %54 : vector<16xf32> to vector<16x1xf32>
    %56 = vector.broadcast %55 : vector<16x1xf32> to vector<16x16xf32>
    %57 = arith.subf %53, %56 : vector<16x16xf32>
    %58 = math.exp %57 : vector<16x16xf32>
    %cst_21 = arith.constant dense<0.000000e+00> : vector<16xf32>
    %59 = vector.multi_reduction <add>, %58, %cst_21 [1] : vector<16x16xf32> to vector<16xf32>
    %60 = vector.shape_cast %59 : vector<16xf32> to vector<16x1xf32>
    %61 = tpu.reciprocal %60 {approx = true} : vector<16x1xf32> -> vector<16x1xf32>
    %62 = vector.broadcast %61 : vector<16x1xf32> to vector<16x16xf32>
    %63 = arith.mulf %58, %62 : vector<16x16xf32>
    %cst_22 = arith.constant dense<0.000000e+00> : vector<16x8xf32>
    %64 = tpu.matmul %63, %51, %cst_22 {dimension_numbers = #tpu.dot_dimension_numbers<[1], [0], [0], [1], [0, 0, 1, 1], [], []>} : vector<16x16xf32>, vector<16x8xf32>, vector<16x8xf32> -> vector<16x8xf32>
    %65 = vector.extract_strided_slice %6 {offsets = [0, 24], sizes = [16, 8], strides = [1, 1]} : vector<16x32xf32> to vector<16x8xf32>
    %66 = vector.extract_strided_slice %7 {offsets = [0, 24], sizes = [16, 8], strides = [1, 1]} : vector<16x32xf32> to vector<16x8xf32>
    %67 = vector.extract_strided_slice %8 {offsets = [0, 24], sizes = [16, 8], strides = [1, 1]} : vector<16x32xf32> to vector<16x8xf32>
    %cst_23 = arith.constant dense<0.000000e+00> : vector<16x16xf32>
    %68 = tpu.matmul %65, %66, %cst_23 {dimension_numbers = #tpu.dot_dimension_numbers<[1], [1], [0], [0], [0, 0, 1, 0], [], []>} : vector<16x8xf32>, vector<16x8xf32>, vector<16x16xf32> -> vector<16x16xf32>
    %69 = arith.addf %68, %16 : vector<16x16xf32>
    %cst_24 = arith.constant dense<0xFF800000> : vector<16xf32>
    %70 = vector.multi_reduction <maximumf>, %69, %cst_24 [1] : vector<16x16xf32> to vector<16xf32>
    %71 = vector.shape_cast %70 : vector<16xf32> to vector<16x1xf32>
    %72 = vector.broadcast %71 : vector<16x1xf32> to vector<16x16xf32>
    %73 = arith.subf %69, %72 : vector<16x16xf32>
    %74 = math.exp %73 : vector<16x16xf32>
    %cst_25 = arith.constant dense<0.000000e+00> : vector<16xf32>
    %75 = vector.multi_reduction <add>, %74, %cst_25 [1] : vector<16x16xf32> to vector<16xf32>
    %76 = vector.shape_cast %75 : vector<16xf32> to vector<16x1xf32>
    %77 = tpu.reciprocal %76 {approx = true} : vector<16x1xf32> -> vector<16x1xf32>
    %78 = vector.broadcast %77 : vector<16x1xf32> to vector<16x16xf32>
    %79 = arith.mulf %74, %78 : vector<16x16xf32>
    %cst_26 = arith.constant dense<0.000000e+00> : vector<16x8xf32>
    %80 = tpu.matmul %79, %67, %cst_26 {dimension_numbers = #tpu.dot_dimension_numbers<[1], [0], [0], [1], [0, 0, 1, 1], [], []>} : vector<16x16xf32>, vector<16x8xf32>, vector<16x8xf32> -> vector<16x8xf32>
    %81 = tpu.concatenate %32, %48, %64, %80 in 1 : vector<16x8xf32>, vector<16x8xf32>, vector<16x8xf32>, vector<16x8xf32> -> vector<16x32xf32>
    %c0_27 = arith.constant 0 : index
    %c0_28 = arith.constant 0 : index
    %82 = vector.load %arg6[%c0_27, %c0_28] : memref<32x32xf32, #tpu.memory_space<vmem>>, vector<32x32xf32>
    %cst_29 = arith.constant dense<0.000000e+00> : vector<16x32xf32>
    %83 = tpu.matmul %81, %82, %cst_29 {dimension_numbers = #tpu.dot_dimension_numbers<[1], [0], [0], [1], [0, 0, 1, 1], [], []>} : vector<16x32xf32>, vector<32x32xf32>, vector<16x32xf32> -> vector<16x32xf32>
    %c0_30 = arith.constant 0 : index
    %c0_31 = arith.constant 0 : index
    %84 = vector.load %arg7[%c0_30, %c0_31] : memref<1x32xf32, #tpu.memory_space<vmem>>, vector<1x32xf32>
    %85 = vector.broadcast %84 : vector<1x32xf32> to vector<16x32xf32>
    %86 = arith.addf %83, %85 : vector<16x32xf32>
    %87 = arith.addf %0, %86 : vector<16x32xf32>
    %c0_32 = arith.constant 0 : index
    %c0_33 = arith.constant 0 : index
    %88 = vector.load %arg8[%c0_32, %c0_33] : memref<1x32xf32, #tpu.memory_space<vmem>>, vector<1x32xf32>
    %c0_34 = arith.constant 0 : index
    %c0_35 = arith.constant 0 : index
    %89 = vector.load %arg9[%c0_34, %c0_35] : memref<1x32xf32, #tpu.memory_space<vmem>>, vector<1x32xf32>
    %cst_36 = arith.constant dense<0.000000e+00> : vector<16xf32>
    %90 = vector.multi_reduction <add>, %87, %cst_36 [1] : vector<16x32xf32> to vector<16xf32>
    %91 = vector.shape_cast %90 : vector<16xf32> to vector<16x1xf32>
    %cst_37 = arith.constant 3.200000e+01 : f32
    %92 = vector.broadcast %cst_37 : f32 to vector<16x1xf32>
    %93 = arith.divf %91, %92 : vector<16x1xf32>
    %94 = vector.broadcast %93 : vector<16x1xf32> to vector<16x32xf32>
    %95 = arith.subf %87, %94 : vector<16x32xf32>
    %96 = arith.mulf %95, %95 : vector<16x32xf32>
    %cst_38 = arith.constant dense<0.000000e+00> : vector<16xf32>
    %97 = vector.multi_reduction <add>, %96, %cst_38 [1] : vector<16x32xf32> to vector<16xf32>
    %98 = vector.shape_cast %97 : vector<16xf32> to vector<16x1xf32>
    %cst_39 = arith.constant 3.200000e+01 : f32
    %99 = vector.broadcast %cst_39 : f32 to vector<16x1xf32>
    %100 = arith.divf %98, %99 : vector<16x1xf32>
    %101 = vector.broadcast %93 : vector<16x1xf32> to vector<16x32xf32>
    %102 = arith.subf %87, %101 : vector<16x32xf32>
    %cst_40 = arith.constant 9.99999974E-6 : f32
    %103 = vector.broadcast %cst_40 : f32 to vector<16x1xf32>
    %104 = arith.addf %100, %103 : vector<16x1xf32>
    %105 = math.rsqrt %104 : vector<16x1xf32>
    %106 = vector.broadcast %105 : vector<16x1xf32> to vector<16x32xf32>
    %107 = arith.mulf %102, %106 : vector<16x32xf32>
    %108 = vector.broadcast %88 : vector<1x32xf32> to vector<16x32xf32>
    %109 = arith.mulf %107, %108 : vector<16x32xf32>
    %110 = vector.broadcast %89 : vector<1x32xf32> to vector<16x32xf32>
    %111 = arith.addf %109, %110 : vector<16x32xf32>
    %c0_41 = arith.constant 0 : index
    %c0_42 = arith.constant 0 : index
    %112 = vector.load %arg10[%c0_41, %c0_42] : memref<32x32xf32, #tpu.memory_space<vmem>>, vector<32x32xf32>
    %cst_43 = arith.constant dense<0.000000e+00> : vector<16x32xf32>
    %113 = tpu.matmul %111, %112, %cst_43 {dimension_numbers = #tpu.dot_dimension_numbers<[1], [0], [0], [1], [0, 0, 1, 1], [], []>} : vector<16x32xf32>, vector<32x32xf32>, vector<16x32xf32> -> vector<16x32xf32>
    %c0_44 = arith.constant 0 : index
    %c0_45 = arith.constant 0 : index
    %114 = vector.load %arg11[%c0_44, %c0_45] : memref<1x32xf32, #tpu.memory_space<vmem>>, vector<1x32xf32>
    %115 = vector.broadcast %114 : vector<1x32xf32> to vector<16x32xf32>
    %116 = arith.addf %113, %115 : vector<16x32xf32>
    %117 = arith.addf %111, %116 : vector<16x32xf32>
    %c0_46 = arith.constant 0 : index
    %c0_47 = arith.constant 0 : index
    %118 = vector.load %arg12[%c0_46, %c0_47] : memref<1x32xf32, #tpu.memory_space<vmem>>, vector<1x32xf32>
    %c0_48 = arith.constant 0 : index
    %c0_49 = arith.constant 0 : index
    %119 = vector.load %arg13[%c0_48, %c0_49] : memref<1x32xf32, #tpu.memory_space<vmem>>, vector<1x32xf32>
    %cst_50 = arith.constant dense<0.000000e+00> : vector<16xf32>
    %120 = vector.multi_reduction <add>, %117, %cst_50 [1] : vector<16x32xf32> to vector<16xf32>
    %121 = vector.shape_cast %120 : vector<16xf32> to vector<16x1xf32>
    %cst_51 = arith.constant 3.200000e+01 : f32
    %122 = vector.broadcast %cst_51 : f32 to vector<16x1xf32>
    %123 = arith.divf %121, %122 : vector<16x1xf32>
    %124 = vector.broadcast %123 : vector<16x1xf32> to vector<16x32xf32>
    %125 = arith.subf %117, %124 : vector<16x32xf32>
    %126 = arith.mulf %125, %125 : vector<16x32xf32>
    %cst_52 = arith.constant dense<0.000000e+00> : vector<16xf32>
    %127 = vector.multi_reduction <add>, %126, %cst_52 [1] : vector<16x32xf32> to vector<16xf32>
    %128 = vector.shape_cast %127 : vector<16xf32> to vector<16x1xf32>
    %cst_53 = arith.constant 3.200000e+01 : f32
    %129 = vector.broadcast %cst_53 : f32 to vector<16x1xf32>
    %130 = arith.divf %128, %129 : vector<16x1xf32>
    %131 = vector.broadcast %123 : vector<16x1xf32> to vector<16x32xf32>
    %132 = arith.subf %117, %131 : vector<16x32xf32>
    %cst_54 = arith.constant 9.99999974E-6 : f32
    %133 = vector.broadcast %cst_54 : f32 to vector<16x1xf32>
    %134 = arith.addf %130, %133 : vector<16x1xf32>
    %135 = math.rsqrt %134 : vector<16x1xf32>
    %136 = vector.broadcast %135 : vector<16x1xf32> to vector<16x32xf32>
    %137 = arith.mulf %132, %136 : vector<16x32xf32>
    %138 = vector.broadcast %118 : vector<1x32xf32> to vector<16x32xf32>
    %139 = arith.mulf %137, %138 : vector<16x32xf32>
    %140 = vector.broadcast %119 : vector<1x32xf32> to vector<16x32xf32>
    %141 = arith.addf %139, %140 : vector<16x32xf32>
    %c0_55 = arith.constant 0 : index
    %c0_56 = arith.constant 0 : index
    %142 = vector.load %arg14[%c0_55, %c0_56] : memref<16x32xf32, #tpu.memory_space<vmem>>, vector<16x32xf32>
    tpu.vector_store %arg14[%c0_55, %c0_56], %141 {strides = array<i32>} : memref<16x32xf32, #tpu.memory_space<vmem>>, vector<16x32xf32>,
    return
  }
  func.func @transform_0(%arg0: i32) -> (i32, i32) {
    %c0_i32 = arith.constant 0 : i32
    %c0_i32_0 = arith.constant 0 : i32
    %c0_i32_1 = arith.constant 0 : i32
    return %c0_i32, %c0_i32_0 : i32, i32
  }
  func.func @transform_1(%arg0: i32) -> (i32, i32) {
    %c0_i32 = arith.constant 0 : i32
    %c0_i32_0 = arith.constant 0 : i32
    %c0_i32_1 = arith.constant 0 : i32
    return %c0_i32, %c0_i32_0 : i32, i32
  }
  func.func @transform_2(%arg0: i32) -> (i32, i32) {
    %c0_i32 = arith.constant 0 : i32
    %c0_i32_0 = arith.constant 0 : i32
    %c0_i32_1 = arith.constant 0 : i32
    return %c0_i32, %c0_i32_0 : i32, i32
  }
  func.func @transform_3(%arg0: i32) -> (i32, i32) {
    %c0_i32 = arith.constant 0 : i32
    %c0_i32_0 = arith.constant 0 : i32
    %c0_i32_1 = arith.constant 0 : i32
    return %c0_i32, %c0_i32_0 : i32, i32
  }
  func.func @transform_4(%arg0: i32) -> (i32, i32) {
    %c0_i32 = arith.constant 0 : i32
    %c0_i32_0 = arith.constant 0 : i32
    %c0_i32_1 = arith.constant 0 : i32
    return %c0_i32, %c0_i32_0 : i32, i32
  }
  func.func @transform_5(%arg0: i32) -> (i32, i32) {
    %c0_i32 = arith.constant 0 : i32
    %c0_i32_0 = arith.constant 0 : i32
    %c0_i32_1 = arith.constant 0 : i32
    return %c0_i32, %c0_i32_0 : i32, i32
  }
  func.func @transform_6(%arg0: i32) -> (i32, i32) {
    %c0_i32 = arith.constant 0 : i32
    %c0_i32_0 = arith.constant 0 : i32
    %c0_i32_1 = arith.constant 0 : i32
    return %c0_i32, %c0_i32_0 : i32, i32
  }
  func.func @transform_7(%arg0: i32) -> (i32, i32) {
    %c0_i32 = arith.constant 0 : i32
    %c0_i32_0 = arith.constant 0 : i32
    %c0_i32_1 = arith.constant 0 : i32
    return %c0_i32, %c0_i32_0 : i32, i32
  }
  func.func @transform_8(%arg0: i32) -> (i32, i32) {
    %c0_i32 = arith.constant 0 : i32
    %c0_i32_0 = arith.constant 0 : i32
    %c0_i32_1 = arith.constant 0 : i32
    return %c0_i32, %c0_i32_0 : i32, i32
  }
  func.func @transform_9(%arg0: i32) -> (i32, i32) {
    %c0_i32 = arith.constant 0 : i32
    %c0_i32_0 = arith.constant 0 : i32
    %c0_i32_1 = arith.constant 0 : i32
    return %c0_i32, %c0_i32_0 : i32, i32
  }
  func.func @transform_10(%arg0: i32) -> (i32, i32) {
    %c0_i32 = arith.constant 0 : i32
    %c0_i32_0 = arith.constant 0 : i32
    %c0_i32_1 = arith.constant 0 : i32
    return %c0_i32, %c0_i32_0 : i32, i32
  }
  func.func @transform_11(%arg0: i32) -> (i32, i32) {
    %c0_i32 = arith.constant 0 : i32
    %c0_i32_0 = arith.constant 0 : i32
    %c0_i32_1 = arith.constant 0 : i32
    return %c0_i32, %c0_i32_0 : i32, i32
  }
  func.func @transform_12(%arg0: i32) -> (i32, i32) {
    %c0_i32 = arith.constant 0 : i32
    %c0_i32_0 = arith.constant 0 : i32
    %c0_i32_1 = arith.constant 0 : i32
    return %c0_i32, %c0_i32_0 : i32, i32
  }
  func.func @transform_13(%arg0: i32) -> (i32, i32) {
    %c0_i32 = arith.constant 0 : i32
    %c0_i32_0 = arith.constant 0 : i32
    %c0_i32_1 = arith.constant 0 : i32
    return %c0_i32, %c0_i32_0 : i32, i32
  }
}

</mosaic_0001>

<bundles_post_ra>
// kernel: tpu_custom_call.1
= control target key start
LH: loop header
LB: loop body
LE: loop exit
PB: predicated region body
PF: predicated region fallthrough
CT: control target
= control target key end

     0   :  { %18 = vsyncpa [#allocation3], 0  ;;  %s2087_s0 = inlined_call_operand.hbm [shape: f32[16,32], index: 0, kind: input, shape index: {}]   ;;  %s2088_s1 = inlined_call_operand.vmem [shape: f32[16,1], index: 1, kind: input, shape index: {}]   ;;  %s2089_s2 = inlined_call_operand.vmem [shape: f32[1,16], index: 2, kind: input, shape index: {}]   ;;  %s2090_s3 = inlined_call_operand.hbm [shape: f32[32,96], index: 3, kind: input, shape index: {}]   ;;  %s2091_s4 = inlined_call_operand.hbm [shape: f32[1,96], index: 4, kind: input, shape index: {}]   ;;  %s2092_s5 = inlined_call_operand.hbm [shape: f32[32,32], index: 5, kind: input, shape index: {}]   ;;  %s2093_s6 = inlined_call_operand.hbm [shape: f32[1,32], index: 6, kind: input, shape index: {}]   ;;  %s2094_s7 = inlined_call_operand.hbm [shape: f32[1,32], index: 7, kind: input, shape index: {}]   ;;  %s2095_s8 = inlined_call_operand.hbm [shape: f32[1,32], index: 8, kind: input, shape index: {}]   ;;  %s2096_s9 = inlined_call_operand.vmem [shape: f32[32,32], index: 9, kind: input, shape index: {}]   ;;  %s2097_s10 = inlined_call_operand.vmem [shape: f32[1,32], index: 10, kind: input, shape index: {}]   ;;  %s2098_s11 = inlined_call_operand.vmem [shape: f32[1,32], index: 11, kind: input, shape index: {}]   ;;  %s2099_s12 = inlined_call_operand.vmem [shape: f32[1,32], index: 12, kind: input, shape index: {}]   ;;  %s2100_s13 = inlined_call_operand.hbm [shape: f32[16,32], index: 13, kind: output, shape index: {}]  }
   0x1   :  { %19 = vsyncpa [#allocation6], 0 }
   0x2   :  { %20 = vsyncpa [#allocation9], 0 }
   0x3   :  { %21 = vsyncpa [#allocation12], 0 }
   0x4   :  { %22 = vsyncpa [#allocation4], 0  ;;  %s1794_s25 = smov [#allocation5]   ;;  %s1795_s27 = smov [#allocation8]  }
   0x5   :  { %s44_s26 = sshll.u32 %s1794_s25, 4  ;;  %s66_s28 = sshll.u32 %s1795_s27, 4  ;;  %s45_s26 = int_to_ptr.vmem [resolvable:$true] %s44_s26  ;;  %s67_s28 = int_to_ptr.vmem [resolvable:$true] %s66_s28 }
   0x6   :  { %s1632_s29 = scalar_lea.vmem %s45_s26, 512  ;;  %p1637_p1 = scmp.lt.s32.totalorder %s45_s26, %s45_s26 }
   0x7   :  { %p1633_p0 = scmp.ne.s32.totalorder %s45_s26, %s1632_s29  ;;  %p1638_p2 = scmp.lt.s32.totalorder %s1632_s29, %s1632_s29 }
   0x9   :  { %p1639_p3 = por %p1638_p2, %p1637_p1 }
   0xb   :  { %p1640_p4 = pnand %p1639_p3, %p1633_p0 }
   0xd   :  { %1643 = shalt.err (!%p1640_p4)
}
   0xe   :  { %s1796_s30 = smov 128   ;;  %s1797_s14 = smov 8  }
   0xf   :  { %50 = dma.hbm_to_vmem [thread:$0]  %s2090_s3, 512, %s45_s26, [#allocation6], %s1796_s30, %s1796_s30, %s1797_s14  }
  0x10   :  { %s1652_s17 = scalar_lea.vmem %s67_s28, 512  ;;  %p1657_p6 = scmp.lt.s32.totalorder %s67_s28, %s67_s28 }
  0x11   :  { %p1653_p5 = scmp.ne.s32.totalorder %s67_s28, %s1652_s17  ;;  %p1658_p7 = scmp.lt.s32.totalorder %s1652_s17, %s1652_s17 }
  0x13   :  { %p1659_p8 = por %p1658_p7, %p1657_p6 }
  0x15   :  { %p1660_p9 = pnand %p1659_p8, %p1653_p5 }
  0x17   :  { %1663 = shalt.err (!%p1660_p9)
}
  0x18   :  { %72 = dma.hbm_to_vmem [thread:$0]  %s2092_s5, 512, %s67_s28, [#allocation9], %s1796_s30, %s1796_s30, %s1797_s14  }
  0x19   :  { %s1798_s20 = smov [#allocation11]   ;;  %s1799_s22 = smov [#allocation2]  }
  0x1a   :  { %s89_s21 = sshll.u32 %s1798_s20, 4  ;;  %s28_s23 = sshll.u32 %s1799_s22, 4  ;;  %s90_s21 = int_to_ptr.vmem [resolvable:$true] %s89_s21  ;;  %s29_s23 = int_to_ptr.vmem [resolvable:$true] %s28_s23 }
  0x1b   :  { %s1672_s3 = scalar_lea.vmem %s90_s21, 16  ;;  %s1676_s24 = scalar_lea.vmem %s90_s21, 32 }
  0x1c   :  { %p1673_p10 = scmp.ne.s32.totalorder %s90_s21, %s1672_s3  ;;  %p1677_p11 = scmp.lt.s32.totalorder %s90_s21, %s90_s21 }
  0x1d   :  { %p1678_p12 = scmp.lt.s32.totalorder %s1676_s24, %s1672_s3 }
  0x1f   :  { %p1679_p13 = por %p1678_p12, %p1677_p11 }
  0x21   :  { %p1680_p0 = pnand %p1679_p13, %p1673_p10 }
  0x23   :  { %1683 = shalt.err (!%p1680_p0)
}
  0x24   :  { %92 = dma.hbm_to_vmem [thread:$0]  %s2094_s7, 16, %s90_s21, [#allocation12]  }
  0x25   :  { %s1692_s27 = scalar_lea.vmem %s29_s23, 256  ;;  %p1697_p2 = scmp.lt.s32.totalorder %s29_s23, %s29_s23 }
  0x26   :  { %p1693_p1 = scmp.ne.s32.totalorder %s29_s23, %s1692_s27  ;;  %p1698_p3 = scmp.lt.s32.totalorder %s1692_s27, %s1692_s27 }
  0x28   :  { %p1699_p4 = por %p1698_p3, %p1697_p2 }
  0x2a   :  { %p1700_p5 = pnand %p1699_p4, %p1693_p1 }
  0x2c   :  { %1703 = shalt.err (!%p1700_p5)
}
  0x2d   :  { %34 = dma.hbm_to_vmem [thread:$0]  %s2087_s0, 256, %s29_s23, [#allocation3], %s1796_s30, %s1796_s30, %s1797_s14  }
  0x2e   :  { %s1800_s29 = smov [#allocation7]   ;;  %s1801_s16 = smov [#allocation10]  }
  0x2f   :  { %s57_s15 = sshll.u32 %s1800_s29, 4  ;;  %s79_s17 = sshll.u32 %s1801_s16, 4  ;;  %s58_s15 = int_to_ptr.vmem [resolvable:$true] %s57_s15  ;;  %s80_s17 = int_to_ptr.vmem [resolvable:$true] %s79_s17 }
  0x30   :  { %s1712_s7 = scalar_lea.vmem %s58_s15, 16  ;;  %s1716_s18 = scalar_lea.vmem %s58_s15, 32 }
  0x31   :  { %p1713_p6 = scmp.ne.s32.totalorder %s58_s15, %s1712_s7  ;;  %p1717_p7 = scmp.lt.s32.totalorder %s58_s15, %s58_s15 }
  0x32   :  { %p1718_p8 = scmp.lt.s32.totalorder %s1716_s18, %s1712_s7 }
  0x34   :  { %p1719_p9 = por %p1718_p8, %p1717_p7 }
  0x36   :  { %p1720_p10 = pnand %p1719_p9, %p1713_p6 }
  0x38   :  { %1723 = shalt.err (!%p1720_p10)
}
  0x39   :  { %60 = dma.hbm_to_vmem [thread:$0]  %s2091_s4, 16, %s58_s15, [#allocation6]  }
  0x3a   :  { %s1732_s21 = scalar_lea.vmem %s80_s17, 16  ;;  %s1736_s0 = scalar_lea.vmem %s80_s17, 32 }
  0x3b   :  { %p1733_p11 = scmp.ne.s32.totalorder %s80_s17, %s1732_s21  ;;  %p1737_p12 = scmp.lt.s32.totalorder %s80_s17, %s80_s17 }
  0x3c   :  { %p1738_p13 = scmp.lt.s32.totalorder %s1736_s0, %s1732_s21 }
  0x3e   :  { %p1739_p0 = por %p1738_p13, %p1737_p12 }
  0x40   :  { %p1740_p1 = pnand %p1739_p0, %p1733_p11 }
  0x42   :  { %1743 = shalt.err (!%p1740_p1)
}
  0x43   :  { %82 = dma.hbm_to_vmem [thread:$0]  %s2093_s6, 16, %s80_s17, [#allocation9]  }
  0x44   :  { %s1802_s3 = smov [#allocation13]  }
  0x45   :  { %s99_s24 = sshll.u32 %s1802_s3, 4  ;;  %s100_s24 = int_to_ptr.vmem [resolvable:$true] %s99_s24 }
  0x46   :  { %s1752_s25 = scalar_lea.vmem %s100_s24, 16  ;;  %s1756_s26 = scalar_lea.vmem %s100_s24, 32 }
  0x47   :  { %p1753_p2 = scmp.ne.s32.totalorder %s100_s24, %s1752_s25  ;;  %p1757_p3 = scmp.lt.s32.totalorder %s100_s24, %s100_s24 }
  0x48   :  { %p1758_p4 = scmp.lt.s32.totalorder %s1756_s26, %s1752_s25 }
  0x4a   :  { %p1759_p5 = por %p1758_p4, %p1757_p3 }
  0x4c   :  { %p1760_p6 = pnand %p1759_p5, %p1753_p2 }
  0x4e   :  { %1763 = shalt.err (!%p1760_p6)
}
  0x4f   :  { %102 = dma.hbm_to_vmem [thread:$0]  %s2095_s8, 16, %s100_s24, [#allocation12]  }
  0x50   :  { %1784 = dma.done.wait [#allocation3], 256  }
  0x51   :  { %1785 = vsyncadd [#allocation3], 4294967040 }
  0x52   :  { %1786 = dma.done.wait [#allocation6], 528  }
  0x53   :  { %1787 = vsyncadd [#allocation6], 4294966768 }
  0x54   :  { %1788 = dma.done.wait [#allocation9], 528  }
  0x55   :  { %1789 = vsyncadd [#allocation9], 4294966768 }
  0x56   :  { %1790 = dma.done.wait [#allocation12], 32  }
  0x57   :  { %1791 = vsyncadd [#allocation12], 4294967264  ;;  %vm145_vm0 = vcmask 261120   ;;  %v137_v0 = vld [vmem:[#allocation5 + $0x18] sm:$0xff]  ;;  %v136_v1 = vld [vmem:[#allocation5 + $0x10] sm:$0xff]  ;;  %vm256_vm1 = vcmask 64512  }
  0x58   :  { %1468 = vmatprep.subr.mxu0 %v137_v0  ;;  %v1919_v2 = vld [vmem:[#allocation2] sm:$0xff]  ;;  %v135_v3 = vld [vmem:[#allocation5 + $0x8] sm:$0xff]  ;;  %v134_v4 = vld [vmem:[#allocation5] sm:$0xff]  ;;  %s1803_s6 = smov 88   ;;  %s1804_s8 = smov 96   ;;  %v1805_v11 = vmov 0  }
  0x59   :  { %1469 = vmatpush3.msra.mxu0 %v137_v0  ;;  %1476 = vmatprep.mubr.msk.f32.mxu0 %vm145_vm0, %v1919_v2  ;;  %v1923_v5 = vld [vmem:[#allocation2 + $0x8] sm:$0xff]  ;;  %v1380_v6 = vld [vmem:[#allocation7] ss:$0 sm:$0xff]  ;;  %s1806_s5 = smov 120   ;;  %v227_v13 = vld [vmem:[%s2088_s1] sm:$0xff]  ;;  %vm340_vm4 = vcmask 130048  }
  0x5a   :  { %1470 = vmatprep.subr.mxu0 %v136_v1  ;;  %1583 = vset.pattern.permute.xlu1 %v1805_v11  ;;  %v228_v12 = vld [vmem:[%s2088_s1 + $0x8] sm:$0xff]  ;;  %v1383_v20 = vld [vmem:[%s2089_s2] ss:$0 sm:$0xff]  ;;  %v1807_v23 = vmov -1e+09   ;;  %s1808_s2 = smov 64  }
  0x5b   :  { %1471 = vmatpush3.msra.mxu0 %v136_v1  ;;  %1582 = vset.pattern.permute.xlu0 %v1805_v11  ;;  %s1809_s7 = smov 56   ;;  %s1810_s18 = smov 80   ;;  %vm1078_vm5 = vcmask 195584  }
  0x5c   :  { %1472 = vmatprep.subr.mxu0 %v135_v3  ;;  %s1811_s19 = smov 112   ;;  %s1812_s20 = smov 48  }
  0x5d   :  { %1473 = vmatpush3.msra.mxu0 %v135_v3  ;;  %s1813_s21 = smov 72   ;;  %s1814_s0 = smov 104  }
  0x5e   :  { %1474 = vmatprep.subr.mxu0 %v134_v4  ;;  %s1815_s22 = smov 40   ;;  %s1816_s23 = smov 16  }
  0x5f   :  { %1475 = vmatpush3.msra.mxu0 %v134_v4  ;;  %s1817_s3 = smov 24   ;;  %s1818_s1 = smov [#allocation14]  }
  0x60   :  { %1477 = vmatmul.mubr.msk.f32.vlgmr.msra.gmra.mxu0 %vm145_vm0, %v1923_v5  ;;  %s1365_s17 = sshll.u32 %s1818_s1, 4  ;;  %s1366_s17 = int_to_ptr.vmem [resolvable:$true] %s1365_s17 }
  0x61   :  { %p1769_p8 = scmp.lt.s32.totalorder %s1366_s17, %s1366_s17 }
 0x120   :  { %v1478_v7 = vpop.f32.mrf.mxu0 }
 0x121   :  { %v1927_v8 = vadd.f32 %v1478_v7, %v1380_v6 }
 0x122   :  { %v218_v9 = vpop.f32.mrf.mxu0 }
 0x123   :  { %v1929_v10 = vadd.f32 %v1380_v6, %v218_v9  ;;  %456 = vrot.lane.b32.xlu1 %v1927_v8, %s1803_s6  ;;  %254 = vrot.lane.b32.xlu0 %v1927_v8, %s1804_s8 }
 0x125   :  { %1483 = vmatprep.mubr.msk.f32.mxu1 %vm256_vm1, %v1929_v10 }
 0x127   :  { %454 = vrot.lane.b32.xlu1 %v1929_v10, %s1803_s6  ;;  %252 = vrot.lane.b32.xlu0 %v1929_v10, %s1804_s8 }
 0x12b   :  { %452 = vrot.lane.b32.xlu1 %v1927_v8, %s1806_s5  ;;  %450 = vrot.lane.b32.xlu0 %v1929_v10, %s1806_s5 }
 0x12f   :  { %237 = vperm.xlu1 %1583, %v228_v12   ;;  %232 = vperm.xlu0 %1582, %v227_v13  }
 0x195   :  { %v255_v14 = vpop.permute.xlu0 %254  ;;  %v457_v15 = vpop.permute.xlu1 %456 }
 0x196   :  { %1479 = vmatprep.subr.msk.mxu1 %vm256_vm1, %v255_v14 }
 0x197   :  { %1480 = vmatpush3.xpose.msk.msra.mxu1 %vm256_vm1, %v255_v14 }
 0x199   :  { %v253_v16 = vpop.permute.xlu0 %252  ;;  %v455_v18 = vpop.permute.xlu1 %454 }
 0x19a   :  { %1481 = vmatprep.subr.msk.mxu1 %vm256_vm1, %v253_v16 }
 0x19b   :  { %1482 = vmatpush3.xpose.msk.msra.mxu1 %vm256_vm1, %v253_v16 }
 0x19c   :  { %1493 = vmatprep.subr.msk.mxu1 %vm256_vm1, %v457_v15 }
 0x19d   :  { %v451_v17 = vpop.permute.xlu0 %450  ;;  %v453_v19 = vpop.permute.xlu1 %452 }
 0x19e   :  { %1484 = vmatmul.mubr.msk.f32.vlgmr.msra.gmra.mxu1 %vm256_vm1, %v1927_v8 }
 0x19f   :  { %1494 = vmatpush3.xpose.msk.msra.mxu1 %vm256_vm1, %v457_v15  ;;  %1497 = vmatprep.mubr.msk.f32.mxu1 %vm256_vm1, %v451_v17 }
 0x1a0   :  { %1495 = vmatprep.subr.msk.mxu1 %vm256_vm1, %v455_v18 }
 0x1a3   :  { %1496 = vmatpush3.xpose.msk.msra.mxu1 %vm256_vm1, %v455_v18 }
 0x1a6   :  { %1498 = vmatmul.mubr.msk.f32.vlgmr.msra.gmra.mxu1 %vm256_vm1, %v453_v19 }
 0x1aa   :  { %v238_v21 = vpop.permute.xlu1 %237  ;;  %v233_v22 = vpop.permute.xlu0 %232 }
 0x1ab   :  { %vm247_vm2 = vcmp.eq.f32.partialorder %v238_v21, %v1383_v20  ;;  %vm246_vm3 = vcmp.eq.f32.partialorder %v233_v22, %v1383_v20 }
 0x1ac   :  { %v1960_v24 = vsel %vm247_vm2, 0.0, %v1807_v23  ;;  %v1962_v25 = vsel %vm246_vm3, 0.0, %v1807_v23 }
 0x25e   :  { %v1485_v26 = vpop.f32.mrf.mxu1 }
 0x25f   :  { %v337_v27 = vadd.f32 %v1485_v26, %v1960_v24 }
 0x260   :  { %v331_v28 = vpop.f32.mrf.mxu1 }
 0x261   :  { %v332_v29 = vadd.f32 %v331_v28, %v1962_v25  ;;  %v344_v30 = vsel %vm340_vm4, %v337_v27, -inf }
 0x262   :  { %345 = vmax.xlane.f32.xlu0 %v344_v30 }
 0x263   :  { %v341_v31 = vsel %vm340_vm4, %v332_v29, -inf }
 0x264   :  { %342 = vmax.xlane.f32.xlu1 %v341_v31 }
 0x266   :  { %v1499_v32 = vpop.f32.mrf.mxu1 }
 0x267   :  { %v538_v33 = vadd.f32 %v1499_v32, %v1960_v24 }
 0x268   :  { %v532_v34 = vpop.f32.mrf.mxu1 }
 0x269   :  { %v533_v35 = vadd.f32 %v532_v34, %v1962_v25  ;;  %v544_v36 = vsel %vm340_vm4, %v538_v33, -inf }
 0x26a   :  { %545 = vmax.xlane.f32.xlu1 %v544_v36 }
 0x26b   :  { %v541_v37 = vsel %vm340_vm4, %v533_v35, -inf }
 0x26c   :  { %542 = vmax.xlane.f32.xlu0 %v541_v37 }
 0x27b   :  { %363 = vrot.lane.b32.xlu1 %v1929_v10, %s1808_s2 }
 0x27f   :  { %565 = vrot.lane.b32.xlu1 %v1927_v8, %s1809_s7 }
 0x282   :  { %365 = vrot.lane.b32.xlu0 %v1927_v8, %s1808_s2  ;;  %s1764_s2 = scalar_lea.vmem %s1366_s17, 256 }
 0x283   :  { %p1765_p7 = scmp.ne.s32.totalorder %s1366_s17, %s1764_s2  ;;  %p1770_p9 = scmp.lt.s32.totalorder %s1764_s2, %s1764_s2 }
 0x285   :  { %p1771_p10 = por %p1770_p9, %p1769_p8 }
 0x287   :  { %p1772_p11 = pnand %p1771_p10, %p1765_p7 }
 0x2eb   :  { %v346_v38 = vpop.xlane.xlu0 %345 }
 0x2ec   :  { %v348_v39 = vsub.f32 %v337_v27, %v346_v38 }
 0x2ed   :  { %v343_v40 = vpop.xlane.xlu1 %342 }
 0x2ee   :  { %v351_v41 = vmul.f32 1.442695, %v348_v39  ;;  %v347_v42 = vsub.f32 %v332_v29, %v343_v40 }
 0x2f0   :  { %1584 = vpow2.f32 %v351_v41  ;;  %v349_v43 = vmul.f32 1.442695, %v347_v42 }
 0x2f2   :  { %1586 = vpow2.f32 %v349_v43 }
 0x2f3   :  { %v546_v44 = vpop.xlane.xlu1 %545 }
 0x2f4   :  { %v548_v45 = vsub.f32 %v538_v33, %v546_v44 }
 0x2f5   :  { %v543_v46 = vpop.xlane.xlu0 %542 }
 0x2f6   :  { %v551_v47 = vmul.f32 1.442695, %v548_v45  ;;  %v547_v48 = vsub.f32 %v533_v35, %v543_v46 }
 0x2f7   :  { %v364_v49 = vpop.permute.xlu1 %363 }
 0x2f8   :  { %1588 = vpow2.f32 %v551_v47  ;;  %v549_v50 = vmul.f32 1.442695, %v547_v48 }
 0x2f9   :  { %v366_v51 = vpop.permute.xlu0 %365 }
 0x2fa   :  { %1590 = vpow2.f32 %v549_v50  ;;  %1486 = vmatprep.subr.mxu0 %v366_v51 }
 0x2fb   :  { %1487 = vmatpush3.msra.mxu0 %v366_v51  ;;  %v566_v53 = vpop.permute.xlu1 %565 }
 0x2fc   :  { %1488 = vmatprep.subr.mxu0 %v364_v49 }
 0x2fd   :  { %v1585_v52 = vpop.eup %1584  ;;  %1489 = vmatpush3.msra.mxu0 %v364_v49 }
 0x2fe   :  { %1500 = vmatprep.subr.mxu0 %v566_v53  ;;  %v356_v54 = vsel %vm340_vm4, %v1585_v52, 0.0 }
 0x2ff   :  { %v1587_v55 = vpop.eup %1586  ;;  %357 = vadd.xlane.f32.xlu1 %v356_v54 }
 0x300   :  { %v353_v56 = vsel %vm340_vm4, %v1587_v55, 0.0 }
 0x301   :  { %354 = vadd.xlane.f32.xlu0 %v353_v56 }
 0x305   :  { %v1589_v57 = vpop.eup %1588 }
 0x306   :  { %v556_v58 = vsel %vm340_vm4, %v1589_v57, 0.0 }
 0x307   :  { %v1591_v59 = vpop.eup %1590  ;;  %557 = vadd.xlane.f32.xlu1 %v556_v58 }
 0x308   :  { %v553_v60 = vsel %vm340_vm4, %v1591_v59, 0.0 }
 0x309   :  { %554 = vadd.xlane.f32.xlu0 %v553_v60 }
 0x318   :  { %656 = vrot.lane.b32.xlu1 %v1927_v8, %s1810_s18 }
 0x31c   :  { %650 = vrot.lane.b32.xlu1 %v1929_v10, %s1811_s19 }
 0x31f   :  { %563 = vrot.lane.b32.xlu0 %v1929_v10, %s1809_s7 }
 0x323   :  { %654 = vrot.lane.b32.xlu0 %v1929_v10, %s1810_s18 }
 0x327   :  { %652 = vrot.lane.b32.xlu0 %v1927_v8, %s1811_s19 }
 0x388   :  { %v358_v61 = vpop.xlane.xlu1 %357 }
 0x389   :  { %1592 = vrcp.f32 %v358_v61 }
 0x38a   :  { %v355_v62 = vpop.xlane.xlu0 %354 }
 0x38b   :  { %1594 = vrcp.f32 %v355_v62 }
 0x390   :  { %v558_v63 = vpop.xlane.xlu1 %557 }
 0x391   :  { %1596 = vrcp.f32 %v558_v63 }
 0x392   :  { %v555_v0 = vpop.xlane.xlu0 %554 }
 0x393   :  { %1598 = vrcp.f32 %v555_v0 }
 0x394   :  { %v657_v9 = vpop.permute.xlu1 %656 }
 0x396   :  { %v1593_v1 = vpop.eup %1592  ;;  %v564_v7 = vpop.permute.xlu0 %563 }
 0x397   :  { %v362_v6 = vmul.f32 %v1593_v1, %v1585_v52 }
 0x398   :  { %v1595_v3 = vpop.eup %1594  ;;  %v651_v15 = vpop.permute.xlu1 %650 }
 0x399   :  { %v361_v4 = vmul.f32 %v1595_v3, %v1587_v55 }
 0x39a   :  { %v655_v16 = vpop.permute.xlu0 %654 }
 0x39b   :  { %1490 = vmatprep.mubr.msk.f32.mxu0 %vm340_vm4, %v361_v4 }
 0x39c   :  { %1491 = vmatmul.mubr.msk.f32.vlgmr.msra.gmra.mxu0 %vm340_vm4, %v362_v6 }
 0x39d   :  { %1501 = vmatpush3.msra.mxu0 %v566_v53 }
 0x39e   :  { %1502 = vmatprep.subr.mxu0 %v564_v7  ;;  %v1597_v11 = vpop.eup %1596  ;;  %v653_v17 = vpop.permute.xlu0 %652 }
 0x39f   :  { %1503 = vmatpush3.msra.mxu0 %v564_v7  ;;  %v562_v14 = vmul.f32 %v1597_v11, %v1589_v57 }
 0x3a0   :  { %v1599_v12 = vpop.eup %1598  ;;  %1507 = vmatprep.subr.msk.mxu0 %vm256_vm1, %v657_v9 }
 0x3a1   :  { %v561_v13 = vmul.f32 %v1599_v12, %v1591_v59 }
 0x3a3   :  { %1504 = vmatprep.mubr.msk.f32.mxu0 %vm340_vm4, %v561_v13 }
 0x3a4   :  { %1505 = vmatmul.mubr.msk.f32.vlgmr.msra.gmra.mxu0 %vm340_vm4, %v562_v14  ;;  %v1084_v14 = vld [vmem:[#allocation8 + $0x18] sm:$0xff] }
 0x3a5   :  { %1508 = vmatpush3.xpose.msk.msra.mxu0 %vm256_vm1, %v657_v9  ;;  %1511 = vmatprep.mubr.msk.f32.mxu0 %vm256_vm1, %v651_v15  ;;  %v1083_v15 = vld [vmem:[#allocation8 + $0x10] sm:$0xff] }
 0x3a6   :  { %1509 = vmatprep.subr.msk.mxu0 %vm256_vm1, %v655_v16 }
 0x3a9   :  { %1510 = vmatpush3.xpose.msk.msra.mxu0 %vm256_vm1, %v655_v16  ;;  %v1082_v16 = vld [vmem:[#allocation8 + $0x8] sm:$0xff] }
 0x3ac   :  { %1512 = vmatmul.mubr.msk.f32.vlgmr.msra.gmra.mxu0 %vm256_vm1, %v653_v17  ;;  %v1081_v17 = vld [vmem:[#allocation8] sm:$0xff] }
 0x45c   :  { %v1996_v18 = vpop.f32.mrf.mxu0 }
 0x45e   :  { %v1998_v19 = vpop.f32.mrf.mxu0 }
 0x464   :  { %v2000_v20 = vpop.f32.mrf.mxu0 }
 0x466   :  { %v2002_v21 = vpop.f32.mrf.mxu0 }
 0x46c   :  { %v1513_v22 = vpop.f32.mrf.mxu0 }
 0x46d   :  { %v738_v23 = vadd.f32 %v1513_v22, %v1960_v24 }
 0x46e   :  { %v732_v26 = vpop.f32.mrf.mxu0 }
 0x46f   :  { %v733_v27 = vadd.f32 %v732_v26, %v1962_v25  ;;  %v744_v28 = vsel %vm340_vm4, %v738_v23, -inf }
 0x470   :  { %745 = vmax.xlane.f32.xlu0 %v744_v28 }
 0x471   :  { %v741_v29 = vsel %vm340_vm4, %v733_v27, -inf }
 0x472   :  { %742 = vmax.xlane.f32.xlu1 %v741_v29 }
 0x4f9   :  { %v746_v30 = vpop.xlane.xlu0 %745 }
 0x4fa   :  { %v748_v31 = vsub.f32 %v738_v23, %v746_v30 }
 0x4fb   :  { %v743_v32 = vpop.xlane.xlu1 %742 }
 0x4fc   :  { %v751_v33 = vmul.f32 1.442695, %v748_v31  ;;  %v747_v34 = vsub.f32 %v733_v27, %v743_v32 }
 0x4fe   :  { %1600 = vpow2.f32 %v751_v33  ;;  %v749_v35 = vmul.f32 1.442695, %v747_v34 }
 0x500   :  { %1602 = vpow2.f32 %v749_v35 }
 0x50b   :  { %v1601_v36 = vpop.eup %1600 }
 0x50c   :  { %v756_v37 = vsel %vm340_vm4, %v1601_v36, 0.0 }
 0x50d   :  { %v1603_v38 = vpop.eup %1602  ;;  %757 = vadd.xlane.f32.xlu1 %v756_v37 }
 0x50e   :  { %v753_v39 = vsel %vm340_vm4, %v1603_v38, 0.0 }
 0x50f   :  { %754 = vadd.xlane.f32.xlu0 %v753_v39 }
 0x51e   :  { %763 = vrot.lane.b32.xlu1 %v1929_v10, %s1812_s20 }
 0x522   :  { %856 = vrot.lane.b32.xlu1 %v1927_v8, %s1813_s21 }
 0x525   :  { %765 = vrot.lane.b32.xlu0 %v1927_v8, %s1812_s20 }
 0x526   :  { %850 = vrot.lane.b32.xlu1 %v1929_v10, %s1814_s0 }
 0x529   :  { %854 = vrot.lane.b32.xlu0 %v1929_v10, %s1813_s21 }
 0x52d   :  { %852 = vrot.lane.b32.xlu0 %v1927_v8, %s1814_s0 }
 0x596   :  { %v758_v40 = vpop.xlane.xlu1 %757 }
 0x597   :  { %1604 = vrcp.f32 %v758_v40 }
 0x598   :  { %v755_v41 = vpop.xlane.xlu0 %754 }
 0x599   :  { %1606 = vrcp.f32 %v755_v41 }
 0x59a   :  { %v764_v42 = vpop.permute.xlu1 %763 }
 0x59c   :  { %v766_v43 = vpop.permute.xlu0 %765 }
 0x59d   :  { %1514 = vmatprep.subr.mxu1 %v766_v43 }
 0x59e   :  { %1515 = vmatpush3.msra.mxu1 %v766_v43  ;;  %v857_v44 = vpop.permute.xlu1 %856 }
 0x59f   :  { %1516 = vmatprep.subr.mxu1 %v764_v42 }
 0x5a0   :  { %1517 = vmatpush3.msra.mxu1 %v764_v42  ;;  %v855_v50 = vpop.permute.xlu0 %854 }
 0x5a1   :  { %1521 = vmatprep.subr.msk.mxu1 %vm256_vm1, %v857_v44 }
 0x5a2   :  { %v851_v49 = vpop.permute.xlu1 %850 }
 0x5a4   :  { %v1605_v45 = vpop.eup %1604  ;;  %v853_v51 = vpop.permute.xlu0 %852 }
 0x5a5   :  { %v762_v48 = vmul.f32 %v1605_v45, %v1601_v36  ;;  %v1408_v36 = vld [vmem:[#allocation10] ss:$0 sm:$0xff] }
 0x5a6   :  { %v1607_v46 = vpop.eup %1606 }
 0x5a7   :  { %v761_v47 = vmul.f32 %v1607_v46, %v1603_v38 }
 0x5a9   :  { %1518 = vmatprep.mubr.msk.f32.mxu1 %vm340_vm4, %v761_v47 }
 0x5aa   :  { %1519 = vmatmul.mubr.msk.f32.vlgmr.msra.gmra.mxu1 %vm340_vm4, %v762_v48 }
 0x5ab   :  { %1522 = vmatpush3.xpose.msk.msra.mxu1 %vm256_vm1, %v857_v44  ;;  %1525 = vmatprep.mubr.msk.f32.mxu1 %vm256_vm1, %v851_v49 }
 0x5ac   :  { %1523 = vmatprep.subr.msk.mxu1 %vm256_vm1, %v855_v50 }
 0x5af   :  { %1524 = vmatpush3.xpose.msk.msra.mxu1 %vm256_vm1, %v855_v50 }
 0x5b2   :  { %1526 = vmatmul.mubr.msk.f32.vlgmr.msra.gmra.mxu1 %vm256_vm1, %v853_v51 }
 0x66a   :  { %v1520_v52 = vpop.f32.mrf.mxu1 }
 0x66c   :  { %v841_v53 = vpop.f32.mrf.mxu1 }
 0x672   :  { %v1527_v54 = vpop.f32.mrf.mxu1 }
 0x673   :  { %v938_v55 = vadd.f32 %v1527_v54, %v1960_v24  ;;  %v1220_v54 = vld [vmem:[%s2096_s9] sm:$0xff] }
 0x674   :  { %v932_v56 = vpop.f32.mrf.mxu1 }
 0x675   :  { %v933_v57 = vadd.f32 %v932_v56, %v1962_v25  ;;  %v944_v58 = vsel %vm340_vm4, %v938_v55, -inf }
 0x676   :  { %945 = vmax.xlane.f32.xlu0 %v944_v58 }
 0x677   :  { %v941_v59 = vsel %vm340_vm4, %v933_v57, -inf }
 0x678   :  { %942 = vmax.xlane.f32.xlu1 %v941_v59 }
 0x6ff   :  { %v946_v60 = vpop.xlane.xlu0 %945 }
 0x700   :  { %v948_v61 = vsub.f32 %v938_v55, %v946_v60 }
 0x701   :  { %v943_v62 = vpop.xlane.xlu1 %942 }
 0x702   :  { %v951_v63 = vmul.f32 1.442695, %v948_v61  ;;  %v947_v0 = vsub.f32 %v933_v57, %v943_v62  ;;  %v1411_v62 = vld [vmem:[#allocation11] ss:$0 sm:$0xff] }
 0x704   :  { %1608 = vpow2.f32 %v951_v63  ;;  %v949_v1 = vmul.f32 1.442695, %v947_v0 }
 0x706   :  { %1610 = vpow2.f32 %v949_v1 }
 0x711   :  { %v1609_v3 = vpop.eup %1608 }
 0x712   :  { %v956_v24 = vsel %vm340_vm4, %v1609_v3, 0.0 }
 0x713   :  { %v1611_v4 = vpop.eup %1610  ;;  %957 = vadd.xlane.f32.xlu1 %v956_v24  ;;  %v1412_v24 = vld [vmem:[#allocation13] ss:$0 sm:$0xff] }
 0x714   :  { %v953_v25 = vsel %vm340_vm4, %v1611_v4, 0.0 }
 0x715   :  { %954 = vadd.xlane.f32.xlu0 %v953_v25 }
 0x724   :  { %963 = vrot.lane.b32.xlu1 %v1929_v10, %s1815_s22 }
 0x728   :  { %1052 = vrot.lane.b32.xlu1 %v2002_v21, %s1797_s14 }
 0x72b   :  { %965 = vrot.lane.b32.xlu0 %v1927_v8, %s1815_s22 }
 0x72c   :  { %1060 = vrot.lane.b32.xlu1 %v841_v53, %s1816_s23  ;;  %v1221_v53 = vld [vmem:[%s2096_s9 + $0x8] sm:$0xff] }
 0x72f   :  { %1054 = vrot.lane.b32.xlu0 %v2000_v20, %s1797_s14 }
 0x733   :  { %1062 = vrot.lane.b32.xlu0 %v1520_v52, %s1816_s23  ;;  %v1222_v52 = vld [vmem:[%s2096_s9 + $0x10] sm:$0xff] }
 0x79c   :  { %v958_v6 = vpop.xlane.xlu1 %957 }
 0x79d   :  { %1612 = vrcp.f32 %v958_v6 }
 0x79e   :  { %v955_v7 = vpop.xlane.xlu0 %954 }
 0x79f   :  { %1614 = vrcp.f32 %v955_v7  ;;  %v1413_v7 = vld [vmem:[%s2097_s10] ss:$0 sm:$0xff] }
 0x7a0   :  { %v964_v11 = vpop.permute.xlu1 %963 }
 0x7a2   :  { %v966_v9 = vpop.permute.xlu0 %965 }
 0x7a3   :  { %1528 = vmatprep.subr.mxu0 %v966_v9 }
 0x7a4   :  { %1529 = vmatpush3.msra.mxu0 %v966_v9  ;;  %v1053_v23 = vpop.permute.xlu1 %1052 }
 0x7a5   :  { %1530 = vmatprep.subr.mxu0 %v964_v11  ;;  %v1074_v28 = vsel %vm256_vm1, %v1998_v19, %v1053_v23 }
 0x7a6   :  { %1531 = vmatpush3.msra.mxu0 %v964_v11  ;;  %v1055_v22 = vpop.permute.xlu0 %1054 }
 0x7a7   :  { %1535 = vmatprep.subr.mxu0 %v1084_v14  ;;  %v1075_v30 = vsel %vm256_vm1, %v1996_v18, %v1055_v22 }
 0x7a8   :  { %v1061_v27 = vpop.permute.xlu1 %1060 }
 0x7a9   :  { %v1076_v31 = vsel %vm340_vm4, %v1074_v28, %v1061_v27 }
 0x7aa   :  { %v1613_v10 = vpop.eup %1612  ;;  %v1063_v26 = vpop.permute.xlu0 %1062 }
 0x7ab   :  { %v962_v8 = vmul.f32 %v1613_v10, %v1609_v3  ;;  %v1077_v33 = vsel %vm340_vm4, %v1075_v30, %v1063_v26 }
 0x7ac   :  { %v1615_v12 = vpop.eup %1614 }
 0x7ad   :  { %v961_v13 = vmul.f32 %v1615_v12, %v1611_v4 }
 0x7af   :  { %1532 = vmatprep.mubr.msk.f32.mxu0 %vm340_vm4, %v961_v13 }
 0x7b0   :  { %1533 = vmatmul.mubr.msk.f32.vlgmr.msra.gmra.mxu0 %vm340_vm4, %v962_v8 }
 0x7b1   :  { %1536 = vmatpush3.msra.mxu0 %v1084_v14 }
 0x7b2   :  { %1537 = vmatprep.subr.mxu0 %v1083_v15 }
 0x7b3   :  { %1538 = vmatpush3.msra.mxu0 %v1083_v15 }
 0x7b4   :  { %1539 = vmatprep.subr.mxu0 %v1082_v16 }
 0x7b5   :  { %1540 = vmatpush3.msra.mxu0 %v1082_v16 }
 0x7b6   :  { %1541 = vmatprep.subr.mxu0 %v1081_v17 }
 0x7b7   :  { %1542 = vmatpush3.msra.mxu0 %v1081_v17 }
 0x870   :  { %v1534_v20 = vpop.f32.mrf.mxu0 }
 0x871   :  { %1070 = vrot.lane.b32.xlu0 %v1534_v20, %s1817_s3 }
 0x872   :  { %v1041_v21 = vpop.f32.mrf.mxu0 }
 0x873   :  { %1068 = vrot.lane.b32.xlu1 %v1041_v21, %s1817_s3 }
 0x8e3   :  { %v1071_v29 = vpop.permute.xlu0 %1070 }
 0x8e4   :  { %v1080_v35 = vsel %vm1078_vm5, %v1077_v33, %v1071_v29 }
 0x8e5   :  { %v1069_v32 = vpop.permute.xlu1 %1068 }
 0x8e6   :  { %v1079_v34 = vsel %vm1078_vm5, %v1076_v31, %v1069_v32 }
 0x8e7   :  { %1543 = vmatprep.mubr.msk.f32.mxu0 %vm145_vm0, %v1079_v34 }
 0x8e8   :  { %1544 = vmatmul.mubr.msk.f32.vlgmr.msra.gmra.mxu0 %vm145_vm0, %v1080_v35 }
 0x9a8   :  { %v1545_v37 = vpop.f32.mrf.mxu0 }
 0x9a9   :  { %v1170_v38 = vadd.f32 %v1545_v37, %v1408_v36  ;;  %v1416_v37 = vld [vmem:[%s2098_s11] ss:$0 sm:$0xff] }
 0x9aa   :  { %v1164_v19 = vpop.f32.mrf.mxu0 }
 0x9ab   :  { %v1165_v39 = vadd.f32 %v1408_v36, %v1164_v19  ;;  %v1174_v40 = vadd.f32 %v1170_v38, %v1923_v5 }
 0x9ad   :  { %v1180_v18 = vsel %vm145_vm0, %v1174_v40, 0.0  ;;  %v1173_v41 = vadd.f32 %v1165_v39, %v1919_v2  ;;  %v1223_v2 = vld [vmem:[%s2096_s9 + $0x18] sm:$0xff]  ;;  %v1417_v39 = vld [vmem:[%s2099_s12] ss:$0 sm:$0xff] }
 0x9ae   :  { %1181 = vadd.xlane.f32.xlu0 %v1180_v18  ;;  %1546 = vmatprep.subr.mxu1 %v1223_v2 }
 0x9af   :  { %v1177_v42 = vsel %vm145_vm0, %v1173_v41, 0.0  ;;  %1547 = vmatpush3.msra.mxu1 %v1223_v2 }
 0x9b0   :  { %1178 = vadd.xlane.f32.xlu1 %v1177_v42  ;;  %1548 = vmatprep.subr.mxu1 %v1222_v52 }
 0x9b1   :  { %1549 = vmatpush3.msra.mxu1 %v1222_v52 }
 0x9b2   :  { %1550 = vmatprep.subr.mxu1 %v1221_v53 }
 0x9b3   :  { %1551 = vmatpush3.msra.mxu1 %v1221_v53 }
 0x9b4   :  { %1552 = vmatprep.subr.mxu1 %v1220_v54 }
 0x9b5   :  { %1553 = vmatpush3.msra.mxu1 %v1220_v54 }
 0xa37   :  { %v1182_v43 = vpop.xlane.xlu0 %1181 }
 0xa38   :  { %v1185_v44 = vmul.f32 0.03125, %v1182_v43 }
 0xa39   :  { %v1179_v45 = vpop.xlane.xlu1 %1178 }
 0xa3a   :  { %v1187_v46 = vsub.f32 %v1174_v40, %v1185_v44  ;;  %v1184_v47 = vmul.f32 0.03125, %v1179_v45 }
 0xa3c   :  { %v1186_v48 = vsub.f32 %v1173_v41, %v1184_v47  ;;  %v1189_v49 = vmul.f32 %v1187_v46, %v1187_v46 }
 0xa3e   :  { %v1193_v50 = vsel %vm145_vm0, %v1189_v49, 0.0  ;;  %v1188_v51 = vmul.f32 %v1186_v48, %v1186_v48 }
 0xa3f   :  { %1194 = vadd.xlane.f32.xlu1 %v1193_v50 }
 0xa40   :  { %v1190_v5 = vsel %vm145_vm0, %v1188_v51, 0.0 }
 0xa41   :  { %1191 = vadd.xlane.f32.xlu0 %v1190_v5 }
 0xac8   :  { %v1195_v55 = vpop.xlane.xlu1 %1194 }
 0xac9   :  { %v1197_v56 = vmul.f32 0.03125, %v1195_v55 }
 0xaca   :  { %v1192_v57 = vpop.xlane.xlu0 %1191 }
 0xacb   :  { %v1199_v58 = vadd.f32 1e-05, %v1197_v56  ;;  %v1196_v59 = vmul.f32 0.03125, %v1192_v57 }
 0xacd   :  { %1616 = vrsqrt.f32 %v1199_v58  ;;  %v1198_v60 = vadd.f32 1e-05, %v1196_v59 }
 0xacf   :  { %1618 = vrsqrt.f32 %v1198_v60 }
 0xada   :  { %v1617_v61 = vpop.eup %1616 }
 0xadb   :  { %v1203_v63 = vmul.f32 %v1617_v61, %v1187_v46 }
 0xadc   :  { %v1619_v0 = vpop.eup %1618 }
 0xadd   :  { %v1202_v1 = vmul.f32 %v1619_v0, %v1186_v48  ;;  %v1211_v3 = vmul.f32 %v1411_v62, %v1203_v63 }
 0xadf   :  { %v1210_v4 = vmul.f32 %v1411_v62, %v1202_v1  ;;  %v1219_v6 = vadd.f32 %v1412_v24, %v1211_v3 }
 0xae1   :  { %v1218_v25 = vadd.f32 %v1412_v24, %v1210_v4 }
 0xae3   :  { %1554 = vmatprep.mubr.msk.f32.mxu1 %vm145_vm0, %v1218_v25 }
 0xae4   :  { %1555 = vmatmul.mubr.msk.f32.vlgmr.msra.gmra.mxu1 %vm145_vm0, %v1219_v6 }
 0xba4   :  { %v1556_v9 = vpop.f32.mrf.mxu1 }
 0xba5   :  { %v1309_v11 = vadd.f32 %v1556_v9, %v1413_v7 }
 0xba6   :  { %v1303_v10 = vpop.f32.mrf.mxu1 }
 0xba7   :  { %v1304_v12 = vadd.f32 %v1413_v7, %v1303_v10  ;;  %v1313_v13 = vadd.f32 %v1309_v11, %v1219_v6 }
 0xba9   :  { %v1319_v8 = vsel %vm145_vm0, %v1313_v13, 0.0  ;;  %v1312_v14 = vadd.f32 %v1304_v12, %v1218_v25 }
 0xbaa   :  { %1320 = vadd.xlane.f32.xlu1 %v1319_v8 }
 0xbab   :  { %v1316_v15 = vsel %vm145_vm0, %v1312_v14, 0.0 }
 0xbac   :  { %1317 = vadd.xlane.f32.xlu0 %v1316_v15 }
 0xc33   :  { %v1321_v16 = vpop.xlane.xlu1 %1320 }
 0xc34   :  { %v1323_v17 = vmul.f32 0.03125, %v1321_v16 }
 0xc35   :  { %v1318_v20 = vpop.xlane.xlu0 %1317 }
 0xc36   :  { %v1325_v21 = vsub.f32 %v1313_v13, %v1323_v17  ;;  %v1322_v22 = vmul.f32 0.03125, %v1318_v20 }
 0xc38   :  { %v1324_v23 = vsub.f32 %v1312_v14, %v1322_v22  ;;  %v1327_v26 = vmul.f32 %v1325_v21, %v1325_v21 }
 0xc3a   :  { %v1331_v27 = vsel %vm145_vm0, %v1327_v26, 0.0  ;;  %v1326_v28 = vmul.f32 %v1324_v23, %v1324_v23 }
 0xc3b   :  { %1332 = vadd.xlane.f32.xlu1 %v1331_v27 }
 0xc3c   :  { %v1328_v29 = vsel %vm145_vm0, %v1326_v28, 0.0 }
 0xc3d   :  { %1329 = vadd.xlane.f32.xlu0 %v1328_v29 }
 0xcc4   :  { %v1333_v30 = vpop.xlane.xlu1 %1332 }
 0xcc5   :  { %v1335_v31 = vmul.f32 0.03125, %v1333_v30 }
 0xcc6   :  { %v1330_v32 = vpop.xlane.xlu0 %1329 }
 0xcc7   :  { %v1337_v33 = vadd.f32 1e-05, %v1335_v31  ;;  %v1334_v34 = vmul.f32 0.03125, %v1330_v32 }
 0xcc9   :  { %1620 = vrsqrt.f32 %v1337_v33  ;;  %v1336_v35 = vadd.f32 1e-05, %v1334_v34 }
 0xccb   :  { %1622 = vrsqrt.f32 %v1336_v35 }
 0xcd6   :  { %v1621_v36 = vpop.eup %1620 }
 0xcd7   :  { %v1341_v38 = vmul.f32 %v1621_v36, %v1325_v21 }
 0xcd8   :  { %v1623_v19 = vpop.eup %1622 }
 0xcd9   :  { %v1340_v40 = vmul.f32 %v1623_v19, %v1324_v23  ;;  %v1349_v18 = vmul.f32 %v1416_v37, %v1341_v38 }
 0xcdb   :  { %v1348_v41 = vmul.f32 %v1416_v37, %v1340_v40  ;;  %v1357_v42 = vadd.f32 %v1417_v39, %v1349_v18 }
 0xcdd   :  { %v1356_v43 = vadd.f32 %v1417_v39, %v1348_v41  ;;  %1359 = vst.msk [vmem:[#allocation14 + $0x8] sm:$0xff] %vm145_vm0, %v1357_v42 }
 0xcdf   :  { %1358 = vst.msk [vmem:[#allocation14] sm:$0xff] %vm145_vm0, %v1356_v43 }
 0xce0   :  { %1775 = shalt.err (!%p1772_p11)
}
 0xce1   :  { %1371 = dma.vmem_to_hbm [thread:$0]  %s1366_s17, 256, %s2100_s13, [#allocation4], %s1796_s30, %s1796_s30, %s1797_s14  }
 0xce2   :  { %1792 = dma.done.wait [#allocation4], 256  }
 0xce3   :  { %1793 = vsyncadd [#allocation4], 4294967040 }
 0xce4   :  { %1375 = vsyncpa [#allocation3], 1 }
 0xce5   :  { %1376 = vsyncpa [#allocation6], 1 }
 0xce6   :  { %1377 = vsyncpa [#allocation9], 1 }
 0xce7   :  { %1378 = vsyncpa [#allocation12], 1 }
 0xce8   :  { %1379 = vsyncpa [#allocation4], 1 }

</bundles_post_ra>
